<compile_context>
chip_gen: v7x
topology: tpu7x:2x2x1
jax: 0.10.0
libtpu: 0.0.40
codegen_flags: <defaults>
</compile_context>

<pallas_src>
import functools

import jax
import jax.numpy as jnp
from jax import lax
from jax.experimental import pallas as pl
from jax.experimental.pallas import tpu as pltpu


# Clamp for log1p(-P): a softmax output can be numerically == 1.0, which would
# give -inf in the log domain (and inf * 0 = nan inside the matmul).
_P_CLAMP = 1.0 - 1e-6


def _round_up(x, m):
    return ((x + m - 1) // m) * m


def _vmem_budget():
    """(per-step tile budget, scoped-VMEM limit) in bytes, safe on v5e/v6e/v7x."""
    tile_budget, vmem_limit = 32 << 20, 48 << 20        # safe under v7x's 64 MiB
    try:
        cap = pltpu.get_tpu_info().vmem_capacity_bytes
        if cap >= (96 << 20):                           # v5e / v6e: 128 MiB physical
            tile_budget, vmem_limit = 80 << 20, 96 << 20
    except Exception:
        pass
    return tile_budget, vmem_limit


def _choose_tiles(R, C, Kp, d_bytes, x_bytes, budget):
    # TC: lane dim of the D block / sublane dim of the (TC, Kp) accumulator.
    # Must be a multiple of 128 or the full C.  For C > 128 force >= 2 blocks so
    # the "parallel" C axis actually feeds both v7x TensorCores.
    if C <= 128:
        TC = C
    else:
        TC = min(512, _round_up(pl.cdiv(C, 2), 128))
        while TC > 128 and 2 * TC * Kp * 4 > budget // 2:
            TC -= 128

    def step_bytes(tr):
        return (2 * tr * TC * d_bytes          # double-buffered D tiles (int8)
                + 2 * tr * Kp * x_bytes        # double-buffered [P|logp] tiles
                + 2 * TC * Kp * 4              # resident f32 accumulator (+wb buffer)
                + tr * (TC + Kp) * 4)          # in-kernel cast temporaries

    TR = 512                                   # multiples of 32: int8-sublane friendly
    while TR > 32 and step_bytes(TR) > budget:
        TR -= 32
    # Keep TR <= R so input blocks never exceed the array extent.
    if R >= 32:
        TR = min(TR, (R // 32) * 32)
    elif R >= 8:
        TR = (R // 8) * 8
    else:
        TR = max(R, 1)
    return TR, TC


def _reduce_kernel(d_ref, x_ref, acc_ref, *, tr, mm_dtype, x_resident):
    """One fused MXU contraction per grid step.

    d_ref:   (TR, TC)            int8 block of the binary pattern D
    x_ref:   (TR, Kp) tile, or (R_pad, Kp) resident fused [P | log1p(-P)] operand
    acc_ref: (TC, Kp) f32        resident accumulator: acc[c,k] += sum_r D[r,c]*X[r,k]
    """
    r = pl.program_id(1)

    @pl.when(r == 0)
    def _init():
        acc_ref[...] = jnp.zeros_like(acc_ref)

    d = d_ref[...].astype(mm_dtype)            # 0/1 is exact in bf16/f32

    if x_resident:
        start = pl.multiple_of(r * tr, tr)
        x = x_ref[pl.ds(start, tr), :]
    else:
        x = x_ref[...]

    # sum_r D[r,c] * X[r,k] == D_block^T @ X_block — a single MXU pass per step
    # (bf16 operands), with f32 accumulation into the lane-dense accumulator.
    acc_ref[...] += lax.dot_general(
        d, x,
        dimension_numbers=(((0,), (0,)), ((), ())),
        preferred_element_type=jnp.float32)


def _pallas_reduce(D, X):
    """acc[c, k] = sum_r D[r, c] * X[r, k]  (f32 accumulation on the MXU).

    D: (R, C)  binary sparsity pattern (int8 recommended; cast in-kernel)
    X: (R, Kp) fused [P | log1p(-P) | zero-pad] operand, already in matmul dtype
    Returns (C, Kp) float32.
    """
    R, C = D.shape
    Kp = X.shape[1]
    budget, vmem_limit = _vmem_budget()
    TR, TC = _choose_tiles(R, C, Kp, D.dtype.itemsize, X.dtype.itemsize, budget)

    # cdiv-correct on R without copying D (the dominant HBM stream): only the
    # small X operand is zero-row-padded, so whatever garbage rows Pallas reads
    # past the end of D hit exact zeros in X and contribute nothing.
    R_pad = pl.cdiv(R, TR) * TR
    if R_pad != R:
        X = jnp.pad(X, ((0, R_pad - R), (0, 0)))

    # Keep X resident in VMEM (constant index_map -> DMA'd once) when small;
    # otherwise stream (TR, Kp) tiles per step.
    x_resident = 2 * R_pad * Kp * X.dtype.itemsize <= min(8 << 20, budget // 4)
    if x_resident:
        x_spec = pl.BlockSpec((R_pad, Kp), lambda c, r: (0, 0))
    else:
        x_spec = pl.BlockSpec((TR, Kp), lambda c, r: (r, 0))

    kernel = functools.partial(_reduce_kernel, tr=TR, mm_dtype=X.dtype,
                               x_resident=x_resident)
    grid = (pl.cdiv(C, TC), R_pad // TR)       # (parallel C axis, reduction R last)
    return pl.pallas_call(
        kernel,
        out_shape=jax.ShapeDtypeStruct((C, Kp), jnp.float32),
        grid_spec=pltpu.PrefetchScalarGridSpec(
            num_scalar_prefetch=0,
            grid=grid,
            in_specs=[
                pl.BlockSpec((TR, TC), lambda c, r: (r, c)),
                x_spec,
            ],
            out_specs=pl.BlockSpec((TC, Kp), lambda c, r: (c, 0)),
        ),
        compiler_params=pltpu.CompilerParams(
            dimension_semantics=("parallel", "arbitrary"),
            vmem_limit_bytes=vmem_limit,
        ),
    )(D, X)


def new_loss_model_forward(W, D, gumbel_noise, i, *, CH, BA,
                           use_bf16_matmul=True):
    """Mirrors new_loss_model.forward(i) in training mode (soft Gumbel-softmax).

    W:            (R, CH*BA) parameter
    D:            (R, C)     binary sparsity-pattern matrix (int8 or float 0/1)
    gumbel_noise: (R, CH*BA) Gumbel(0,1) sample (deterministic, built in-script)
    """
    R = W.shape[0]
    C = D.shape[1]
    K = CH * BA

    # `temp` is computed in the torch code but GumbelSoftmax.forward always
    # passes temperature=1, so it is effectively dead (kept for fidelity).
    _temp = 1000.0 - 999.0 / 3999.0 * i  # noqa: F841

    # Gumbel-softmax sample (training, force_hard=False -> soft), temperature=1.
    logits = W + gumbel_noise
    P_flat = jax.nn.softmax(logits / 1.0, axis=-1)        # (R, K) f32
    P = P_flat.reshape(R, CH, BA)

    # Log-domain operand hoisted out of the kernel: EUP log1p runs once here,
    # not once per C block inside the grid.
    logp = jnp.log1p(-jnp.minimum(P_flat, jnp.float32(_P_CLAMP)))

    # One fused, lane-dense operand: [P | logp], K padded to a multiple of 128
    # so the kernel's accumulator uses full 128-lane (unmasked) stores.
    Kp = max(128, _round_up(2 * K, 128))
    X = jnp.concatenate([P_flat, logp], axis=1)           # (R, 2K)
    if Kp != 2 * K:
        X = jnp.pad(X, ((0, 0), (0, Kp - 2 * K)))
    mm_dtype = jnp.bfloat16 if use_bf16_matmul else jnp.float32
    X = X.astype(mm_dtype)

    # D streamed as int8 (binary pattern -> exact; 4x less HBM read than f32),
    # widened to the matmul dtype inside the kernel (v7x MXU has no int path).
    # TODO(synk): D is constant across training steps — pre-cast it to int8 once
    # outside the step function to avoid re-converting it every call.
    D_i8 = D if D.dtype == jnp.int8 else D.astype(jnp.int8)

    # Hot path: single fused contraction D^T @ [P | logp]  (Pallas, MXU).
    acc = _pallas_reduce(D_i8, X)                          # (C, Kp) f32
    sum_ck = acc[:, :K]                                    # sum_r D*P
    prod_ck = jnp.exp(acc[:, K:2 * K])                     # prod_r (1 - D*P)

    # --- tiny finalization reductions (plain-JAX glue, fused in the same jit) ---
    nnz_ch_ba = sum_ck.sum(axis=0).reshape(CH, BA)         # x.sum(dim=[0,1])
    # TODO(synk): torch code calls torch.max(nnz_ch_ba, dim=2) on a 2-D tensor
    # (out of range in the original); interpreted here as the max over BA.
    max_nnz_ch = nnz_ch_ba.max(axis=1)                     # (CH,)

    # col_ch = 1 - prod_{r,ba} (1 - x)  -> (C, CH)
    col_ch = 1.0 - prod_ck.reshape(C, CH, BA).prod(axis=2)
    num_col_ch = col_ch.sum(axis=0)                        # (CH,)

    num_row_ch = P.sum(axis=(0, 2))                        # (CH,)

    sum_x_c_ch = sum_ck.reshape(C, CH, BA).sum(axis=2)     # (C, CH) = x.sum(dim=[0,3])
    col_density_ch = (sum_x_c_ch / num_row_ch[None, :]
                      / num_col_ch[None, :]).sum(axis=0)   # (CH,)

    tot_ch = max_nnz_ch + num_col_ch + num_row_ch          # (CH,)

    # TODO(synk): torch returns num_row_sel as a host Python float via .item();
    # here it stays a 0-d device array (same value).
    num_row_sel = jnp.sum((P_flat.max(axis=1) > 0.99).astype(jnp.float32))

    return (P, tot_ch, max_nnz_ch, num_col_ch, num_row_ch,
            nnz_ch_ba, col_density_ch, num_row_sel)


def _reference(W, D, gumbel_noise, *, CH, BA):
    """Pure-JAX reference of the same math (sanity check at small shapes)."""
    R, C = D.shape
    P = jax.nn.softmax(W + gumbel_noise, axis=-1).reshape(R, CH, BA)
    x = P.reshape(R, 1, CH, BA) * D.reshape(R, C, 1, 1)
    nnz_ch_ba = x.sum(axis=(0, 1))
    col_ch = 1.0 - jnp.prod(jnp.prod(1.0 - x, axis=0), axis=2)
    sum_x_c_ch = x.sum(axis=(0, 3))
    num_row_ch = P.sum(axis=(0, 2))
    num_col_ch = col_ch.sum(axis=0)
    col_density_ch = (sum_x_c_ch / num_row_ch[None, :]
                      / num_col_ch[None, :]).sum(axis=0)
    return nnz_ch_ba, num_col_ch, col_density_ch, num_row_ch


if __name__ == "__main__":
    key = jax.random.PRNGKey(0)
    kd, kw, kg = jax.random.split(key, 3)

    # Small shapes consistent with the module: D is (R, C), W is (R, CH*BA).
    # R deliberately not a multiple of the R-tile to exercise the cdiv/tail path.
    R, C, CH, BA = 60, 32, 4, 8
    K = CH * BA

    # D: binary sparsity-pattern matrix (required by the log-product rewrite).
    D_f32 = jax.random.bernoulli(kd, 0.3, (R, C)).astype(jnp.float32)
    D_i8 = D_f32.astype(jnp.int8)                 # compact stream fed to the kernel

    # W: kaiming_uniform_ on a (R, K) tensor -> U(-sqrt(6/fan_in), sqrt(6/fan_in)).
    bound = (6.0 / K) ** 0.5
    W = jax.random.uniform(kw, (R, K), jnp.float32, -bound, bound)

    # Deterministic Gumbel(0,1) noise, exactly as sample_gumbel_like does it.
    eps = 1e-10
    u = jax.random.uniform(kg, (R, K), jnp.float32)
    gumbel = -jnp.log(eps - jnp.log(u + eps))

    ref_nnz, ref_num_col, ref_col_dens, ref_num_row = _reference(
        W, D_f32, gumbel, CH=CH, BA=BA)

    # ---------- strict-accuracy path (f32 matmul operands) ----------
    fwd_f32 = jax.jit(functools.partial(new_loss_model_forward, CH=CH, BA=BA,
                                        use_bf16_matmul=False))
    outs = jax.block_until_ready(fwd_f32(W, D_i8, gumbel, jnp.float32(0.0)))
    (P, tot_ch, max_nnz_ch, num_col_ch, num_row_ch,
     nnz_ch_ba, col_density_ch, num_row_sel) = outs

    assert P.shape == (R, CH, BA)
    assert tot_ch.shape == (CH,) and nnz_ch_ba.shape == (CH, BA)
    assert max_nnz_ch.shape == (CH,) and col_density_ch.shape == (CH,)
    assert jnp.allclose(nnz_ch_ba, ref_nnz, atol=1e-4), "nnz_ch_ba mismatch"
    assert jnp.allclose(num_col_ch, ref_num_col, atol=1e-4), "num_col_ch mismatch"
    assert jnp.allclose(num_row_ch, ref_num_row, atol=1e-4), "num_row_ch mismatch"
    assert jnp.allclose(col_density_ch, ref_col_dens, atol=1e-4), \
        "col_density_ch mismatch"
    assert jnp.allclose(tot_ch, max_nnz_ch + num_col_ch + num_row_ch, atol=1e-5)

    # ---------- fast path (bf16 operands, single MXU pass) ----------
    fwd_bf16 = jax.jit(functools.partial(new_loss_model_forward, CH=CH, BA=BA,
                                         use_bf16_matmul=True))
    outs_bf = jax.block_until_ready(fwd_bf16(W, D_i8, gumbel, jnp.float32(0.0)))
    (_, tot_bf, _, num_col_bf, _, nnz_bf, dens_bf, _) = outs_bf

    assert jnp.allclose(nnz_bf, ref_nnz, rtol=2e-2, atol=2e-2), \
        "bf16 nnz_ch_ba mismatch"
    assert jnp.allclose(num_col_bf, ref_num_col, rtol=2e-2, atol=2e-2), \
        "bf16 num_col_ch mismatch"
    assert jnp.allclose(dens_bf, ref_col_dens, rtol=2e-2, atol=2e-2), \
        "bf16 col_density_ch mismatch"

    print("KERNEL_OK")
</pallas_src>

<mosaic_0001>
module attributes {stable_mosaic.version = 11 : i64} {
  func.func @_reduce_kernel(%arg0: i32, %arg1: i32, %arg2: memref<32x32xi8, #tpu.memory_space<vmem>>, %arg3: memref<64x128xf32, #tpu.memory_space<vmem>>, %arg4: memref<32x128xf32, #tpu.memory_space<vmem>>) attributes {dimension_semantics = [#tpu.dimension_semantics<parallel>, #tpu.dimension_semantics<arbitrary>], iteration_bounds = array<i64: 1, 2>, scalar_prefetch = 0 : i64, scratch_operands = 0 : i64, tpu.core_type = #tpu.core_type<tc>, window_params = [{transform_indices = @transform_0, window_bounds = array<i64: 32, 32>}, {pipeline_mode = #tpu.pipeline_mode<synchronous>, transform_indices = @transform_1, window_bounds = array<i64: 64, 128>}, {transform_indices = @transform_2, window_bounds = array<i64: 32, 128>}]} {
    %c0_i32 = arith.constant 0 : i32
    %0 = arith.cmpi eq, %arg1, %c0_i32 : i32
    %1 = arith.extui %0 : i1 to i32
    %c0_i32_0 = arith.constant 0 : i32
    %2 = arith.cmpi ne, %1, %c0_i32_0 : i32
    scf.if %2 {
      %cst_7 = arith.constant 0.000000e+00 : f32
      %13 = vector.broadcast %cst_7 : f32 to vector<32x128xf32>
      %c0_8 = arith.constant 0 : index
      %c0_9 = arith.constant 0 : index
      %14 = vector.load %arg4[%c0_8, %c0_9] : memref<32x128xf32, #tpu.memory_space<vmem>>, vector<32x128xf32>
      tpu.vector_store %arg4[%c0_8, %c0_9], %13 {strides = array<i32>} : memref<32x128xf32, #tpu.memory_space<vmem>>, vector<32x128xf32>,
    } else {
    }
    %c0 = arith.constant 0 : index
    %c0_1 = arith.constant 0 : index
    %3 = vector.load %arg2[%c0, %c0_1] : memref<32x32xi8, #tpu.memory_space<vmem>>, vector<32x32xi8>
    %4 = arith.sitofp %3 : vector<32x32xi8> to vector<32x32xf32>
    %c32_i32 = arith.constant 32 : i32
    %5 = arith.muli %arg1, %c32_i32 : i32
    %6 = tpu.assume_multiple %5, 32 : i32
    %7 = arith.index_cast %6 : i32 to index
    %c0_2 = arith.constant 0 : index
    %8 = vector.load %arg3[%7, %c0_2] : memref<64x128xf32, #tpu.memory_space<vmem>>, vector<32x128xf32>
    %c0_3 = arith.constant 0 : index
    %c0_4 = arith.constant 0 : index
    %9 = vector.load %arg4[%c0_3, %c0_4] : memref<32x128xf32, #tpu.memory_space<vmem>>, vector<32x128xf32>
    %cst = arith.constant dense<0.000000e+00> : vector<32x128xf32>
    %10 = tpu.matmul %4, %8, %cst {dimension_numbers = #tpu.dot_dimension_numbers<[0], [0], [1], [1], [0, 1, 1, 1], [], []>} : vector<32x32xf32>, vector<32x128xf32>, vector<32x128xf32> -> vector<32x128xf32>
    %11 = arith.addf %9, %10 : vector<32x128xf32>
    %c0_5 = arith.constant 0 : index
    %c0_6 = arith.constant 0 : index
    %12 = vector.load %arg4[%c0_5, %c0_6] : memref<32x128xf32, #tpu.memory_space<vmem>>, vector<32x128xf32>
    tpu.vector_store %arg4[%c0_5, %c0_6], %11 {strides = array<i32>} : memref<32x128xf32, #tpu.memory_space<vmem>>, vector<32x128xf32>,
    return
  }
  func.func @transform_0(%arg0: i32, %arg1: i32) -> (i32, i32) {
    %c0_i32 = arith.constant 0 : i32
    return %arg1, %arg0 : i32, i32
  }
  func.func @transform_1(%arg0: i32, %arg1: i32) -> (i32, i32) {
    %c0_i32 = arith.constant 0 : i32
    %c0_i32_0 = arith.constant 0 : i32
    %c0_i32_1 = arith.constant 0 : i32
    return %c0_i32, %c0_i32_0 : i32, i32
  }
  func.func @transform_2(%arg0: i32, %arg1: i32) -> (i32, i32) {
    %c0_i32 = arith.constant 0 : i32
    %c0_i32_0 = arith.constant 0 : i32
    return %arg0, %c0_i32 : i32, i32
  }
}

</mosaic_0001>

<bundles_post_ra>
// kernel: new_loss_model_forward.1
= control target key start
LH: loop header
LB: loop body
LE: loop exit
PB: predicated region body
PF: predicated region fallthrough
CT: control target
= control target key end

     0   :  { %s530_s9 = smov 0   ;;  %s532_s10 = smov 0   ;;  %s599_s0 = inlined_call_operand.vmem [shape: s8[60,32], index: 0, kind: input, shape index: {}]   ;;  %s600_s1 = inlined_call_operand.vmem [shape: f32[64,128], index: 1, kind: input, shape index: {}]   ;;  %s601_s2 = inlined_call_operand.vmem [shape: f32[32,128], index: 2, kind: output, shape index: {}]  }
   0x1   :  { %s534_s11 = smov 0  }
   0x2 LB: > { %s21_s12 = sadd.s32 1, %s508_s10  ;;  %p408_p0 = scmp.ge.s32.totalorder %s512_s11, 1  ;;  %s512_s11 = sphi %s534_s11, %s12_s11   ;;  %s508_s10 = sphi %s532_s10, %s603_s10   ;;  %s504_s9 = sphi %s530_s9, %s602_s9  }
   0x3   : > { %p22_p1 = scmp.ge.s32.totalorder %s21_s12, 2  ;;  %p130_p2 = scmp.lt.s32.totalorder %s512_s11, 3 }
   0x5   : > { %s605_s12 = smov (%p22_p1, %s21_s12), 0  ;;  %p131_p3 = pnand %p408_p0, %p130_p2 }
   0x6   : > { %s409_s13 = sshll.u32 (!%p131_p3), %s504_s9, 2  ;;  %p411_p5 = scmp.ne.s32.totalorder (!%p131_p3), %s504_s9, 0 }
   0x7   : > { %134 = sbr.rel (%p131_p3) target bundleno = 383 (0x17f), region = 28  ;;  %p156_p4 = scmp.lt.s32.totalorder (!%p131_p3), %s409_s13, 7 }
   0xe   : > { %s607_s13 = smov (!%p156_p4, %s409_s13), 7  ;;  %173 = sbr.rel (%p411_p5) target bundleno = 21 (0x15), region = 32 }
   0xf   : > { %s410_s14 = sshll.u32 %s607_s13, 1  ;;  %v514_v0 = vmov (!%p411_p5), 0.0  }
  0x10   : > { %s162_s17 = scalar_lea.vmem %s599_s0, %s410_s14  ;;  %174 = vst [vmem:[%s601_s2] sm:$0xff] (!%p411_p5), %v514_v0  ;;  %175 = vst [vmem:[%s601_s2 + $0x8] sm:$0xff] (!%p411_p5), %v514_v0 }
  0x11   : > { %176 = vst [vmem:[%s601_s2 + $0x10] sm:$0xff] (!%p411_p5), %v514_v0  ;;  %177 = vst [vmem:[%s601_s2 + $0x18] sm:$0xff] (!%p411_p5), %v514_v0 }
  0x15 PF: > { %v422_v1 = vld [vmem:[%s162_s17] sm:$0xff]   ;;  %s412_s26 = sshll.u32 %s504_s9, 5  ;;  %vm232_vm0 = vcmask 261120  }
  0x16   : > { %v423_v2 = vunpack.c.0.s8 %v422_v1  ;;  %v424_v3 = vunpack.c.1.s8 %v422_v1  ;;  %s191_s29 = scalar_lea.vmem %s600_s1, %s412_s26  ;;  %v427_v12 = vunpack.c.2.s8 %v422_v1  ;;  %v428_v14 = vunpack.c.3.s8 %v422_v1 }
  0x17   : > { %v192_v4 = vld [vmem:[%s191_s29] sm:$0xff]  ;;  %v193_v5 = vld [vmem:[%s191_s29 + $0x8] sm:$0xff]  ;;  %v194_v7 = vld [vmem:[%s191_s29 + $0x10] sm:$0xff] }
  0x18   : > { %v186_v6 = vcvt.s32.f32 %v423_v2  ;;  %v195_v8 = vld [vmem:[%s191_s29 + $0x18] sm:$0xff]  ;;  %v451_v9 = vpack.c.bf16 %v193_v5, %v192_v4  ;;  %v187_v11 = vcvt.s32.f32 %v424_v3  ;;  %v188_v13 = vcvt.s32.f32 %v427_v12  ;;  %v197_v20 = vld [vmem:[%s601_s2 + $0x8] sm:$0xff]  ;;  %v196_v21 = vld [vmem:[%s601_s2] sm:$0xff] }
  0x19   : > { %v455_v10 = vpack.c.bf16 %v195_v8, %v194_v7  ;;  %v189_v15 = vcvt.s32.f32 %v428_v14  ;;  %v199_v26 = vld [vmem:[%s601_s2 + $0x18] sm:$0xff]  ;;  %v198_v27 = vld [vmem:[%s601_s2 + $0x10] sm:$0xff] }
  0x1a   : > { %200 = vxpose.xlu0.b32.start [1/4] (short) (narrow) %v186_v6, 32  ;;  %452 = vmatprep.subr.bf16.mxu0 %v451_v9 }
  0x1b   : > { %459 = vmatprep.subr.bf16.mxu1 %v451_v9  ;;  %454 = vmatpush3.bf16.msra.mxu0 %v451_v9 }
  0x1c   : > { %461 = vmatpush3.bf16.msra.mxu1 %v451_v9  ;;  %456 = vmatprep.subr.bf16.mxu0 %v455_v10 }
  0x1d   : > { %460 = vmatprep.subr.bf16.mxu1 %v455_v10 }
  0x1e   : > { %201 = vxpose.xlu0.b32.cont [2/4] (short) (narrow) %v187_v11, 32 }
  0x1f   : > { %458 = vmatpush3.bf16.msra.mxu0 %v455_v10 }
  0x20   : > { %462 = vmatpush3.bf16.msra.mxu1 %v455_v10 }
  0x22   : > { %202 = vxpose.xlu0.b32.cont [3/4] (short) (narrow) %v188_v13, 32 }
  0x26   : > { %203 = vxpose.xlu0.b32.end [4/4] (short) (narrow) %v189_v15, 32 }
  0x9a   : > { %v216_v16 = vpop.trf.xlu0 }
  0x9b   : > { %445 = vmatprep.mubr.msk.f32.mxu0 %vm232_vm0, %v216_v16 }
  0x9e   : > { %v217_v17 = vpop.trf.xlu0 }
  0x9f   : > { %446 = vmatmul.mubr.msk.f32.vlgmr.msra.gmra.mrb[0].mxu0 %vm232_vm0, %v217_v17 }
  0xa2   : > { %v218_v18 = vpop.trf.xlu0 }
  0xa3   : > { %448 = vmatprep.mubr.msk.f32.mxu1 %vm232_vm0, %v218_v18 }
  0xa6   : > { %v219_v19 = vpop.trf.xlu0 }
  0xa7   : > { %449 = vmatmul.mubr.msk.f32.vlgmr.msra.gmra.mrb[0].mxu1 %vm232_vm0, %v219_v19 }
 0x172   : > { %v447_v22 = vpop.f32.mrb[0].mxu0 }
 0x173   : > { %v331_v23 = vadd.f32 %v447_v22, %v197_v20  ;;  %v311_v24 = vpop.f32.mrb[1].mxu0 }
 0x174   : > { %v330_v25 = vadd.f32 %v311_v24, %v196_v21 }
 0x175   : > { %335 = vst [vmem:[%s601_s2 + $0x8] sm:$0xff] %v331_v23 }
 0x176   : > { %334 = vst [vmem:[%s601_s2] sm:$0xff] %v330_v25 }
 0x17a   : > { %v450_v28 = vpop.f32.mrb[0].mxu1 }
 0x17b   : > { %v333_v29 = vadd.f32 %v450_v28, %v199_v26  ;;  %v321_v30 = vpop.f32.mrb[1].mxu1 }
 0x17c   : > { %v332_v31 = vadd.f32 %v321_v30, %v198_v27 }
 0x17d   : > { %337 = vst [vmem:[%s601_s2 + $0x18] sm:$0xff] %v333_v29 }
 0x17e   : > { %336 = vst [vmem:[%s601_s2 + $0x10] sm:$0xff] %v332_v31 }
 0x17f PF: > { %s12_s11 = sadd.s32 1, %s512_s11   ;;  %s602_s9 = smov %s508_s10 }
 0x180   : > { %p9_p6 = scmp.ge.s32.totalorder %s12_s11, 4   ;;  %s603_s10 = smov %s605_s12 }
 0x182   :  { %11 = sbr.rel (!%p9_p6) target bundleno = 2 (0x2), region = 63 }

</bundles_post_ra>
